<compile_context>
chip_gen: v5e
topology: v5e:2x2
jax: 0.10.0
libtpu: 0.0.40
codegen_flags: <defaults>
</compile_context>

<pallas_src>
import jax
import jax.numpy as jnp
from jax.experimental import pallas as pl
from jax.experimental.pallas import tpu as pltpu

LN_EPS = 1e-5  # matches torch.nn.LayerNorm default
_DEFAULT_VMEM_BUDGET = 32 * 1024 * 1024   # working-set budget for tile sizing
_VMEM_LIMIT_BYTES = 48 * 1024 * 1024      # scoped VMEM limit (fits all gens)
_MAX_TK = 512                             # K-reduction tile when K is large


def _round_up(x, m):
    return ((x + m - 1) // m) * m


def _layernorm_rows(z, gamma_f32, beta_f32, out_dtype):
    """One-pass LayerNorm over the last (lane) axis of an f32 (rows, H) tile."""
    inv_h = jnp.float32(1.0 / z.shape[-1])
    s = jnp.sum(z, axis=-1, keepdims=True)
    ss = jnp.sum(z * z, axis=-1, keepdims=True)
    mean = s * inv_h
    var = ss * inv_h - mean * mean
    inv_std = jax.lax.rsqrt(var + LN_EPS)
    return ((z - mean) * inv_std * gamma_f32 + beta_f32).astype(out_dtype)


# --------------------------------------------------------------------------
# Generic path: arbitrary sublayer output -> fused residual add + LayerNorm.
# --------------------------------------------------------------------------
def _add_layernorm_kernel(x_ref, y_ref, gamma_ref, beta_ref, o_ref):
    z = x_ref[...].astype(jnp.float32) + y_ref[...].astype(jnp.float32)
    o_ref[...] = _layernorm_rows(
        z,
        gamma_ref[...].astype(jnp.float32),
        beta_ref[...].astype(jnp.float32),
        o_ref.dtype,
    )


def sublayer_connection(x, sublayer_out, gamma, beta, *,
                        vmem_budget_bytes=_DEFAULT_VMEM_BUDGET):
    """Fused (x + sublayer_out) -> LayerNorm over last axis.

    x, sublayer_out: [..., H]; gamma, beta: [H].
    """
    orig_shape = x.shape
    H = x.shape[-1]
    x2 = x.reshape(-1, H)
    y2 = sublayer_out.reshape(-1, H)
    R = x2.shape[0]
    itemsize = jnp.dtype(x.dtype).itemsize

    # Row tile: 3 row-slabs (x, y, out), each double-buffered by the pipeline.
    tm = vmem_budget_bytes // max(1, 6 * H * itemsize)
    tm = int(max(8, min(1024, (tm // 8) * 8)))
    if R <= tm:
        tm = _round_up(R, 8)
        r_pad = tm
    else:
        r_pad = _round_up(R, tm)

    if r_pad != R:
        pad = ((0, r_pad - R), (0, 0))
        x2 = jnp.pad(x2, pad)
        y2 = jnp.pad(y2, pad)

    gamma2 = gamma.reshape(1, H)
    beta2 = beta.reshape(1, H)

    out2 = pl.pallas_call(
        _add_layernorm_kernel,
        out_shape=jax.ShapeDtypeStruct((r_pad, H), x.dtype),
        grid_spec=pltpu.PrefetchScalarGridSpec(
            num_scalar_prefetch=0,
            grid=(r_pad // tm,),
            in_specs=[
                pl.BlockSpec((tm, H), lambda i: (i, 0)),   # x rows
                pl.BlockSpec((tm, H), lambda i: (i, 0)),   # sublayer(x) rows
                pl.BlockSpec((1, H), lambda i: (0, 0)),    # gamma (resident)
                pl.BlockSpec((1, H), lambda i: (0, 0)),    # beta  (resident)
            ],
            out_specs=pl.BlockSpec((tm, H), lambda i: (i, 0)),
        ),
        compiler_params=pltpu.CompilerParams(
            dimension_semantics=("parallel",),
            vmem_limit_bytes=_VMEM_LIMIT_BYTES,
        ),
    )(x2, y2, gamma2, beta2)

    if r_pad != R:
        out2 = out2[:R]
    return out2.reshape(orig_shape)


# --------------------------------------------------------------------------
# Fully-fused path: LayerNorm(x + (x @ W + b)) in a single pallas_call.
# --------------------------------------------------------------------------
def _fused_single_k_kernel(x_ref, w_ref, b_ref, gamma_ref, beta_ref, o_ref):
    """K fits one tile: x tile is both matmul LHS and residual (read once)."""
    acc = jnp.dot(x_ref[...], w_ref[...], preferred_element_type=jnp.float32)
    z = (acc
         + b_ref[...].astype(jnp.float32)
         + x_ref[...].astype(jnp.float32))
    o_ref[...] = _layernorm_rows(
        z,
        gamma_ref[...].astype(jnp.float32),
        beta_ref[...].astype(jnp.float32),
        o_ref.dtype,
    )


def _fused_multi_k_kernel(x_lhs_ref, w_ref, x_res_ref, b_ref,
                          gamma_ref, beta_ref, o_ref, acc_ref):
    k = pl.program_id(1)

    @pl.when(k == 0)
    def _():
        acc_ref[...] = jnp.zeros_like(acc_ref)

    acc_ref[...] += jnp.dot(x_lhs_ref[...], w_ref[...],
                            preferred_element_type=jnp.float32)

    @pl.when(k == pl.num_programs(1) - 1)
    def _():
        z = (acc_ref[...]
             + b_ref[...].astype(jnp.float32)
             + x_res_ref[...].astype(jnp.float32))
        o_ref[...] = _layernorm_rows(
            z,
            gamma_ref[...].astype(jnp.float32),
            beta_ref[...].astype(jnp.float32),
            o_ref.dtype,
        )


def fused_linear_sublayer_connection(x, W, b, gamma, beta, *,
                                     vmem_budget_bytes=_DEFAULT_VMEM_BUDGET):
    """LayerNorm(x + (x @ W + b)) fused end-to-end (Linear sublayer case)."""
    orig_shape = x.shape
    K = x.shape[-1]
    assert W.shape == (K, K), "residual connection requires a square Linear"
    H = W.shape[1]
    x2 = x.reshape(-1, K)
    R = x2.shape[0]
    itemsize = jnp.dtype(x.dtype).itemsize

    b2 = b.reshape(1, H)
    gamma2 = gamma.reshape(1, H)
    beta2 = beta.reshape(1, H)

    single_k = K <= _MAX_TK

    if single_k:
        # ---- single K tile: no reduction axis, x read once (LHS == residual).
        fixed = 2 * K * H * itemsize                       # W (conservatively 2x)
        per_row = (2 * K + 2 * H) * itemsize + 4 * H       # x, out (dbl-buf) + f32 z
        tm = (vmem_budget_bytes - fixed) // max(1, per_row)
        tm = int(max(8, min(1024, (tm // 8) * 8)))
        if R <= tm:
            tm = _round_up(R, 8)
            r_pad = tm
        else:
            r_pad = _round_up(R, tm)

        x_p = x2 if r_pad == R else jnp.pad(x2, ((0, r_pad - R), (0, 0)))

        out2 = pl.pallas_call(
            _fused_single_k_kernel,
            out_shape=jax.ShapeDtypeStruct((r_pad, H), x.dtype),
            grid_spec=pltpu.PrefetchScalarGridSpec(
                num_scalar_prefetch=0,
                grid=(r_pad // tm,),
                in_specs=[
                    pl.BlockSpec((tm, K), lambda i: (i, 0)),  # x (LHS + residual)
                    pl.BlockSpec((K, H), lambda i: (0, 0)),   # W     (resident)
                    pl.BlockSpec((1, H), lambda i: (0, 0)),   # bias  (resident)
                    pl.BlockSpec((1, H), lambda i: (0, 0)),   # gamma (resident)
                    pl.BlockSpec((1, H), lambda i: (0, 0)),   # beta  (resident)
                ],
                out_specs=pl.BlockSpec((tm, H), lambda i: (i, 0)),
            ),
            compiler_params=pltpu.CompilerParams(
                dimension_semantics=("parallel",),
                vmem_limit_bytes=_VMEM_LIMIT_BYTES,
            ),
        )(x_p, W, b2, gamma2, beta2)
    else:
        # ---- K-tiled reduction with f32 accumulator + LayerNorm epilogue.
        tk = _MAX_TK
        k_pad = _round_up(K, tk)

        fixed = 2 * tk * H * itemsize                       # W k-slab (dbl-buf)
        per_row = (2 * tk + 4 * H) * itemsize + 4 * H       # lhs, res, out + f32 acc
        tm = (vmem_budget_bytes - fixed) // max(1, per_row)
        tm = int(max(8, min(1024, (tm // 8) * 8)))
        if R <= tm:
            tm = _round_up(R, 8)
            r_pad = tm
        else:
            r_pad = _round_up(R, tm)

        x_res = x2 if r_pad == R else jnp.pad(x2, ((0, r_pad - R), (0, 0)))
        x_lhs = x_res if k_pad == K else jnp.pad(x_res, ((0, 0), (0, k_pad - K)))
        Wp = W if k_pad == K else jnp.pad(W, ((0, k_pad - K), (0, 0)))

        out2 = pl.pallas_call(
            _fused_multi_k_kernel,
            out_shape=jax.ShapeDtypeStruct((r_pad, H), x.dtype),
            grid_spec=pltpu.PrefetchScalarGridSpec(
                num_scalar_prefetch=0,
                grid=(r_pad // tm, k_pad // tk),
                in_specs=[
                    pl.BlockSpec((tm, tk), lambda i, k: (i, k)),  # x as matmul LHS
                    pl.BlockSpec((tk, H), lambda i, k: (k, 0)),   # W k-slab
                    pl.BlockSpec((tm, H), lambda i, k: (i, 0)),   # x residual (resident over k)
                    pl.BlockSpec((1, H), lambda i, k: (0, 0)),    # bias   (resident)
                    pl.BlockSpec((1, H), lambda i, k: (0, 0)),    # gamma  (resident)
                    pl.BlockSpec((1, H), lambda i, k: (0, 0)),    # beta   (resident)
                ],
                out_specs=pl.BlockSpec((tm, H), lambda i, k: (i, 0)),
                scratch_shapes=[pltpu.VMEM((tm, H), jnp.float32)],
            ),
            compiler_params=pltpu.CompilerParams(
                dimension_semantics=("parallel", "arbitrary"),
                vmem_limit_bytes=_VMEM_LIMIT_BYTES,
            ),
        )(x_lhs, Wp, x_res, b2, gamma2, beta2)

    if r_pad != R:
        out2 = out2[:R]
    return out2.reshape(orig_shape)


# --------------------------------------------------------------------------
# Pure-JAX reference (two-pass LayerNorm, torch semantics).
# --------------------------------------------------------------------------
def reference(x, y, gamma, beta):
    z = (x + y).astype(jnp.float32)
    mean = jnp.mean(z, axis=-1, keepdims=True)
    var = jnp.mean((z - mean) ** 2, axis=-1, keepdims=True)
    normed = (z - mean) * jax.lax.rsqrt(var + LN_EPS)
    return (normed * gamma + beta).astype(x.dtype)


if __name__ == "__main__":
    B, S, H = 2, 8, 32
    key = jax.random.PRNGKey(0)
    kx, kw, kb = jax.random.split(key, 3)

    x = jax.random.normal(kx, (B, S, H), dtype=jnp.float32)

    # Deterministic example sublayer: Linear(H, H).
    W = jax.random.normal(kw, (H, H), dtype=jnp.float32) * 0.02
    b = jax.random.normal(kb, (H,), dtype=jnp.float32) * 0.02

    # nn.LayerNorm(size) default init: weight = ones, bias = zeros.
    gamma = jnp.ones((H,), dtype=jnp.float32)
    beta = jnp.zeros((H,), dtype=jnp.float32)

    # Path 1: fully fused Linear sublayer + residual + LayerNorm (one kernel).
    out_fused = fused_linear_sublayer_connection(x, W, b, gamma, beta)
    out_fused = jax.block_until_ready(out_fused)

    # Path 2: arbitrary sublayer evaluated in plain JAX + fused add+LayerNorm.
    y = jnp.einsum("bsh,hk->bsk", x, W) + b
    out_generic = sublayer_connection(x, y, gamma, beta)
    out_generic = jax.block_until_ready(out_generic)

    ref = reference(x, y, gamma, beta)
    assert out_fused.shape == x.shape and out_fused.dtype == x.dtype
    assert out_generic.shape == x.shape and out_generic.dtype == x.dtype
    # Fused path includes an in-kernel MXU matmul -> allow matmul precision slack.
    assert jnp.allclose(out_fused, ref, atol=2e-3, rtol=2e-3), "fused mismatch"
    assert jnp.allclose(out_generic, ref, atol=1e-4, rtol=1e-4), "generic mismatch"

    print("KERNEL_OK")
</pallas_src>

<mosaic_0001>
module attributes {stable_mosaic.version = 11 : i64} {
  func.func @_fused_single_k_kernel(%arg0: i32, %arg1: memref<16x32xf32, #tpu.memory_space<vmem>>, %arg2: memref<32x32xf32, #tpu.memory_space<vmem>>, %arg3: memref<1x32xf32, #tpu.memory_space<vmem>>, %arg4: memref<1x32xf32, #tpu.memory_space<vmem>>, %arg5: memref<1x32xf32, #tpu.memory_space<vmem>>, %arg6: memref<16x32xf32, #tpu.memory_space<vmem>>) attributes {dimension_semantics = [#tpu.dimension_semantics<parallel>], iteration_bounds = array<i64: 1>, scalar_prefetch = 0 : i64, scratch_operands = 0 : i64, tpu.core_type = #tpu.core_type<tc>, window_params = [{transform_indices = @transform_0, window_bounds = array<i64: 16, 32>}, {pipeline_mode = #tpu.pipeline_mode<synchronous>, transform_indices = @transform_1, window_bounds = array<i64: 32, 32>}, {pipeline_mode = #tpu.pipeline_mode<synchronous>, transform_indices = @transform_2, window_bounds = array<i64: 1, 32>}, {pipeline_mode = #tpu.pipeline_mode<synchronous>, transform_indices = @transform_3, window_bounds = array<i64: 1, 32>}, {pipeline_mode = #tpu.pipeline_mode<synchronous>, transform_indices = @transform_4, window_bounds = array<i64: 1, 32>}, {transform_indices = @transform_5, window_bounds = array<i64: 16, 32>}]} {
    %c0 = arith.constant 0 : index
    %c0_0 = arith.constant 0 : index
    %0 = vector.load %arg1[%c0, %c0_0] : memref<16x32xf32, #tpu.memory_space<vmem>>, vector<16x32xf32>
    %c0_1 = arith.constant 0 : index
    %c0_2 = arith.constant 0 : index
    %1 = vector.load %arg2[%c0_1, %c0_2] : memref<32x32xf32, #tpu.memory_space<vmem>>, vector<32x32xf32>
    %cst = arith.constant dense<0.000000e+00> : vector<16x32xf32>
    %2 = tpu.matmul %0, %1, %cst {dimension_numbers = #tpu.dot_dimension_numbers<[1], [0], [0], [1], [0, 0, 1, 1], [], []>} : vector<16x32xf32>, vector<32x32xf32>, vector<16x32xf32> -> vector<16x32xf32>
    %c0_3 = arith.constant 0 : index
    %c0_4 = arith.constant 0 : index
    %3 = vector.load %arg3[%c0_3, %c0_4] : memref<1x32xf32, #tpu.memory_space<vmem>>, vector<1x32xf32>
    %4 = vector.broadcast %3 : vector<1x32xf32> to vector<16x32xf32>
    %5 = arith.addf %2, %4 : vector<16x32xf32>
    %c0_5 = arith.constant 0 : index
    %c0_6 = arith.constant 0 : index
    %6 = vector.load %arg1[%c0_5, %c0_6] : memref<16x32xf32, #tpu.memory_space<vmem>>, vector<16x32xf32>
    %7 = arith.addf %5, %6 : vector<16x32xf32>
    %c0_7 = arith.constant 0 : index
    %c0_8 = arith.constant 0 : index
    %8 = vector.load %arg4[%c0_7, %c0_8] : memref<1x32xf32, #tpu.memory_space<vmem>>, vector<1x32xf32>
    %c0_9 = arith.constant 0 : index
    %c0_10 = arith.constant 0 : index
    %9 = vector.load %arg5[%c0_9, %c0_10] : memref<1x32xf32, #tpu.memory_space<vmem>>, vector<1x32xf32>
    %cst_11 = arith.constant dense<0.000000e+00> : vector<16xf32>
    %10 = vector.multi_reduction <add>, %7, %cst_11 [1] : vector<16x32xf32> to vector<16xf32>
    %11 = vector.shape_cast %10 : vector<16xf32> to vector<16x1xf32>
    %12 = arith.mulf %7, %7 : vector<16x32xf32>
    %cst_12 = arith.constant dense<0.000000e+00> : vector<16xf32>
    %13 = vector.multi_reduction <add>, %12, %cst_12 [1] : vector<16x32xf32> to vector<16xf32>
    %14 = vector.shape_cast %13 : vector<16xf32> to vector<16x1xf32>
    %cst_13 = arith.constant 3.125000e-02 : f32
    %15 = vector.broadcast %cst_13 : f32 to vector<16x1xf32>
    %16 = arith.mulf %11, %15 : vector<16x1xf32>
    %cst_14 = arith.constant 3.125000e-02 : f32
    %17 = vector.broadcast %cst_14 : f32 to vector<16x1xf32>
    %18 = arith.mulf %14, %17 : vector<16x1xf32>
    %19 = arith.mulf %16, %16 : vector<16x1xf32>
    %20 = arith.subf %18, %19 : vector<16x1xf32>
    %cst_15 = arith.constant 9.99999974E-6 : f32
    %21 = vector.broadcast %cst_15 : f32 to vector<16x1xf32>
    %22 = arith.addf %20, %21 : vector<16x1xf32>
    %23 = math.rsqrt %22 : vector<16x1xf32>
    %24 = vector.broadcast %16 : vector<16x1xf32> to vector<16x32xf32>
    %25 = arith.subf %7, %24 : vector<16x32xf32>
    %26 = vector.broadcast %23 : vector<16x1xf32> to vector<16x32xf32>
    %27 = arith.mulf %25, %26 : vector<16x32xf32>
    %28 = vector.broadcast %8 : vector<1x32xf32> to vector<16x32xf32>
    %29 = arith.mulf %27, %28 : vector<16x32xf32>
    %30 = vector.broadcast %9 : vector<1x32xf32> to vector<16x32xf32>
    %31 = arith.addf %29, %30 : vector<16x32xf32>
    %c0_16 = arith.constant 0 : index
    %c0_17 = arith.constant 0 : index
    %32 = vector.load %arg6[%c0_16, %c0_17] : memref<16x32xf32, #tpu.memory_space<vmem>>, vector<16x32xf32>
    tpu.vector_store %arg6[%c0_16, %c0_17], %31 {strides = array<i32>} : memref<16x32xf32, #tpu.memory_space<vmem>>, vector<16x32xf32>,
    return
  }
  func.func @transform_0(%arg0: i32) -> (i32, i32) {
    %c0_i32 = arith.constant 0 : i32
    %c0_i32_0 = arith.constant 0 : i32
    return %arg0, %c0_i32 : i32, i32
  }
  func.func @transform_1(%arg0: i32) -> (i32, i32) {
    %c0_i32 = arith.constant 0 : i32
    %c0_i32_0 = arith.constant 0 : i32
    %c0_i32_1 = arith.constant 0 : i32
    return %c0_i32, %c0_i32_0 : i32, i32
  }
  func.func @transform_2(%arg0: i32) -> (i32, i32) {
    %c0_i32 = arith.constant 0 : i32
    %c0_i32_0 = arith.constant 0 : i32
    %c0_i32_1 = arith.constant 0 : i32
    return %c0_i32, %c0_i32_0 : i32, i32
  }
  func.func @transform_3(%arg0: i32) -> (i32, i32) {
    %c0_i32 = arith.constant 0 : i32
    %c0_i32_0 = arith.constant 0 : i32
    %c0_i32_1 = arith.constant 0 : i32
    return %c0_i32, %c0_i32_0 : i32, i32
  }
  func.func @transform_4(%arg0: i32) -> (i32, i32) {
    %c0_i32 = arith.constant 0 : i32
    %c0_i32_0 = arith.constant 0 : i32
    %c0_i32_1 = arith.constant 0 : i32
    return %c0_i32, %c0_i32_0 : i32, i32
  }
  func.func @transform_5(%arg0: i32) -> (i32, i32) {
    %c0_i32 = arith.constant 0 : i32
    %c0_i32_0 = arith.constant 0 : i32
    return %arg0, %c0_i32 : i32, i32
  }
}

</mosaic_0001>

<bundles_post_ra>
// kernel: tpu_custom_call.1
= control target key start
LH: loop header
LB: loop body
LE: loop exit
PB: predicated region body
PF: predicated region fallthrough
CT: control target
= control target key end

     0   :  { %10 = vsyncpa [#allocation3], 0  ;;  %s343_s0 = inlined_call_operand.hbm [shape: f32[16,32], index: 0, kind: input, shape index: {}]   ;;  %s344_s1 = inlined_call_operand.hbm [shape: f32[32,32], index: 1, kind: input, shape index: {}]   ;;  %s345_s2 = inlined_call_operand.vmem [shape: f32[1,32], index: 2, kind: input, shape index: {}]   ;;  %s346_s3 = inlined_call_operand.vmem [shape: f32[1,32], index: 3, kind: input, shape index: {}]   ;;  %s347_s4 = inlined_call_operand.vmem [shape: f32[1,32], index: 4, kind: input, shape index: {}]   ;;  %s348_s5 = inlined_call_operand.hbm [shape: f32[16,32], index: 5, kind: output, shape index: {}]  }
   0x1   :  { %11 = vsyncpa [#allocation6], 0 }
   0x2   :  { %12 = vsyncpa [#allocation4], 0  ;;  %s17_s20 = sshll.u32 %s343_s0, 4  ;;  %s273_s21 = smov [#allocation2]   ;;  %s18_s20 = int_to_ptr.hbm [resolvable:$true] %s17_s20 }
   0x3   :  { %s19_s22 = sshll.u32 %s273_s21, 4  ;;  %s30_s25 = sshll.u32 %s344_s1, 4  ;;  %s20_s22 = int_to_ptr.vmem [resolvable:$true] %s19_s22  ;;  %s31_s25 = int_to_ptr.hbm [resolvable:$true] %s30_s25 }
   0x4   :  { %s274_s26 = smov 128   ;;  %s275_s27 = smov 8  }
   0x5   :  { %25 = dma.hbm_to_vmem [thread:$0]  %s18_s20, 256, %s20_s22, [#allocation3], %s274_s26, %s274_s26, %s275_s27  }
   0x6   :  { %s276_s28 = smov [#allocation5]  }
   0x7   :  { %s32_s29 = sshll.u32 %s276_s28, 4  ;;  %s33_s29 = int_to_ptr.vmem [resolvable:$true] %s32_s29 }
   0x8   :  { %38 = dma.hbm_to_vmem [thread:$0]  %s31_s25, 512, %s33_s29, [#allocation6], %s274_s26, %s274_s26, %s275_s27  }
   0x9   :  { %267 = dma.done.wait [#allocation3], 256  }
   0xa   :  { %268 = vsyncadd [#allocation3], 4294967040 }
   0xb   :  { %269 = dma.done.wait [#allocation6], 512  }
   0xc   :  { %270 = vsyncadd [#allocation6], 4294966784  ;;  %v58_v0 = vld [vmem:[#allocation5 + $0x18] sm:$0xff]  ;;  %v57_v1 = vld [vmem:[#allocation5 + $0x10] sm:$0xff]  ;;  %vm63_vm0 = vcmask 261120   ;;  %s163_s11 = sshll.u32 %s348_s5, 4  ;;  %s164_s11 = int_to_ptr.hbm [resolvable:$true] %s163_s11 }
   0xd   :  { %82 = vmatpush.msra.mxu0 %v58_v0  ;;  %179 = vmatpush.msra.mxu1 %v58_v0  ;;  %v56_v2 = vld [vmem:[#allocation5 + $0x8] sm:$0xff]  ;;  %v55_v3 = vld [vmem:[#allocation5] sm:$0xff]  ;;  %v53_v4 = vld [vmem:[#allocation2] sm:$0xff] }
   0xe   :  { %v54_v5 = vld [vmem:[#allocation2 + $0x8] sm:$0xff]  ;;  %v188_v6 = vld [vmem:[%s345_s2] ss:$0 sm:$0xff] }
   0xf   :  { %83 = vmatpush.msra.mxu0 %v57_v1  ;;  %180 = vmatpush.msra.mxu1 %v57_v1  ;;  %v189_v42 = vld [vmem:[%s346_s3] ss:$0 sm:$0xff]  ;;  %s277_s3 = smov [#allocation7]  }
  0x10   :  { %v190_v46 = vld [vmem:[%s347_s4] ss:$0 sm:$0xff]  ;;  %s161_s8 = sshll.u32 %s277_s3, 4  ;;  %s162_s8 = int_to_ptr.vmem [resolvable:$true] %s161_s8 }
  0x11   :  { %84 = vmatpush.msra.mxu0 %v56_v2  ;;  %181 = vmatpush.msra.mxu1 %v56_v2 }
  0x13   :  { %85 = vmatpush.msra.mxu0 %v55_v3  ;;  %182 = vmatpush.msra.mxu1 %v55_v3 }
  0x14   :  { %177 = vmatmul.msk.f32.vlgmr.msra.gmra.mxu0 %vm63_vm0, %v53_v4  ;;  %178 = vmatmul.msk.f32.vlgmr.msra.gmra.mxu1 %vm63_vm0, %v54_v5 }
  0x91   :  { %v87_v7 = vpop.f32.mrf.mxu0  ;;  %v90_v8 = vpop.f32.mrf.mxu1 }
  0x92   :  { %v88_v9 = vadd.f32 %v188_v6, %v87_v7  ;;  %v91_v10 = vadd.f32 %v188_v6, %v90_v8 }
  0x94   :  { %v93_v11 = vadd.f32 %v88_v9, %v53_v4  ;;  %v94_v13 = vadd.f32 %v91_v10, %v54_v5 }
  0x96   :  { %v97_v12 = vsel %vm63_vm0, %v93_v11, 0.0  ;;  %v103_v14 = vmul.f32 %v93_v11, %v93_v11  ;;  %v104_v16 = vmul.f32 %v94_v13, %v94_v13  ;;  %v100_v17 = vsel %vm63_vm0, %v94_v13, 0.0 }
  0x97   :  { %98 = vadd.xlane.f32.xlu0 %v97_v12 }
  0x98   :  { %v105_v15 = vsel %vm63_vm0, %v103_v14, 0.0  ;;  %v108_v18 = vsel %vm63_vm0, %v104_v16, 0.0 }
  0x99   :  { %106 = vadd.xlane.f32.xlu1 %v105_v15 }
  0x9f   :  { %101 = vadd.xlane.f32.xlu0 %v100_v17 }
  0xa1   :  { %109 = vadd.xlane.f32.xlu1 %v108_v18 }
 0x10a   :  { %v99_v19 = vpop.xlane.xlu0 %98 }
 0x10b   :  { %v111_v20 = vmul.f32 0.03125, %v99_v19 }
 0x10c   :  { %v107_v21 = vpop.xlane.xlu1 %106 }
 0x10d   :  { %v115_v22 = vmul.f32 %v111_v20, %v111_v20  ;;  %v113_v23 = vmul.f32 0.03125, %v107_v21  ;;  %v141_v41 = vsub.f32 %v93_v11, %v111_v20 }
 0x10f   :  { %v117_v24 = vsub.f32 %v113_v23, %v115_v22 }
 0x111   :  { %v119_v25 = vadd.f32 1e-05, %v117_v24 }
 0x112   :  { %v102_v26 = vpop.xlane.xlu0 %101 }
 0x113   :  { %191 = vrsqrt.f32 %v119_v25  ;;  %v112_v27 = vmul.f32 0.03125, %v102_v26  ;;  %vm127_vm2 = vweird.f32 %v119_v25 }
 0x114   :  { %v110_v28 = vpop.xlane.xlu1 %109 }
 0x115   :  { %v116_v29 = vmul.f32 %v112_v27, %v112_v27  ;;  %v114_v30 = vmul.f32 0.03125, %v110_v28  ;;  %v142_v52 = vsub.f32 %v94_v13, %v112_v27 }
 0x117   :  { %v118_v31 = vsub.f32 %v114_v30, %v116_v29 }
 0x119   :  { %v192_v32 = vpop.eup %191  ;;  %v120_v33 = vadd.f32 1e-05, %v118_v31 }
 0x11a   :  { %v122_v34 = vmul.f32 %v192_v32, %v119_v25  ;;  %vm128_vm1 = vweird.f32 %v192_v32 }
 0x11b   :  { %193 = vrsqrt.f32 %v120_v33  ;;  %vm129_vm3 = vmor %vm127_vm2, %vm128_vm1  ;;  %vm137_vm5 = vweird.f32 %v120_v33 }
 0x11c   :  { %v123_v35 = vmul.f32 %v192_v32, %v122_v34 }
 0x11e   :  { %v124_v36 = vmul.f32 0.5, %v123_v35 }
 0x120   :  { %v125_v37 = vsub.f32 1.5, %v124_v36 }
 0x121   :  { %v194_v38 = vpop.eup %193 }
 0x122   :  { %v126_v39 = vmul.f32 %v192_v32, %v125_v37  ;;  %v132_v40 = vmul.f32 %v194_v38, %v120_v33  ;;  %vm138_vm4 = vweird.f32 %v194_v38 }
 0x123   :  { %vm139_vm6 = vmor %vm137_vm5, %vm138_vm4 }
 0x124   :  { %v130_v43 = vsel %vm129_vm3, %v192_v32, %v126_v39  ;;  %v133_v44 = vmul.f32 %v194_v38, %v132_v40 }
 0x125   :  { %v143_v45 = vmul.f32 %v141_v41, %v130_v43 }
 0x126   :  { %v134_v47 = vmul.f32 0.5, %v133_v44 }
 0x127   :  { %v148_v48 = vmul.f32 %v189_v42, %v143_v45 }
 0x128   :  { %v135_v49 = vsub.f32 1.5, %v134_v47 }
 0x129   :  { %v153_v50 = vadd.f32 %v190_v46, %v148_v48 }
 0x12a   :  { %v136_v51 = vmul.f32 %v194_v38, %v135_v49 }
 0x12b   :  { %155 = vst.msk [vmem:[#allocation7] sm:$0xff] %vm63_vm0, %v153_v50 }
 0x12c   :  { %v140_v53 = vsel %vm139_vm6, %v194_v38, %v136_v51 }
 0x12d   :  { %v144_v54 = vmul.f32 %v142_v52, %v140_v53 }
 0x12f   :  { %v149_v55 = vmul.f32 %v189_v42, %v144_v54 }
 0x131   :  { %v154_v56 = vadd.f32 %v190_v46, %v149_v55 }
 0x133   :  { %156 = vst.msk [vmem:[#allocation7 + $0x8] sm:$0xff] %vm63_vm0, %v154_v56 }
 0x134   :  { %169 = dma.vmem_to_hbm [thread:$0]  %s162_s8, 256, %s164_s11, [#allocation4], %s274_s26, %s274_s26, %s275_s27  }
 0x135   :  { %271 = dma.done.wait [#allocation4], 256  }
 0x136   :  { %272 = vsyncadd [#allocation4], 4294967040 }
 0x137   :  { %174 = vsyncpa [#allocation3], 1 }
 0x138   :  { %175 = vsyncpa [#allocation6], 1 }
 0x139   :  { %176 = vsyncpa [#allocation4], 1 }

</bundles_post_ra>
